<compile_context>
chip_gen: v7x
topology: tpu7x:2x2x1
jax: 0.10.0
libtpu: 0.0.40
codegen_flags: <defaults>
</compile_context>

<pallas_src>
import functools

import jax
import jax.numpy as jnp
from jax import lax
from jax.experimental import pallas as pl
from jax.experimental.pallas import tpu as pltpu

EPS = 1e-5  # BatchNorm eps (PyTorch default)


def _round_up(x, m):
    return ((x + m - 1) // m) * m


# ----------------------------------------------------------------------------
# Pallas kernel: fused conv3x3 (as 3 shifted matmuls) + BN affine + ReLU/PReLU
# ----------------------------------------------------------------------------
def _luconv_kernel(x_ref, w_ref, scale_ref, shift_ref, alpha_ref, o_ref, *,
                   width, relu):
    """One batch image per grid step.

    x_ref:  (1, Lpad, Kp)    bf16  flattened image, 3 width-taps packed into Kp,
                                   padded by one image row (width) front/back.
    w_ref:  (3, Kp, Coutp)   bf16  one weight slab per height-tap di.
    scale/shift/alpha: (1, Coutp) f32  folded BN affine (+ PReLU slope).
    o_ref:  (1, Lout, Coutp) f32   Lout = (H+2)*W rows (border rows are junk,
                                   discarded by the wrapper).
    """
    lout = o_ref.shape[1]
    coutp = o_ref.shape[2]

    acc = jnp.zeros((lout, coutp), jnp.float32)
    for di in range(3):                       # unrolled height-tap loop
        # 8-aligned static window of the VMEM-resident block (offsets 0, W, 2W)
        a = x_ref[0, di * width: di * width + lout, :]          # (Lout, Kp) bf16
        acc = acc + jnp.dot(a, w_ref[di],
                            preferred_element_type=jnp.float32)

    z = acc * scale_ref[...] + shift_ref[...]                   # folded BatchNorm
    if relu:
        z = jnp.maximum(z, 0.0)                                 # ReLU
    else:
        z = jnp.where(z > 0.0, z, alpha_ref[...] * z)           # PReLU (per channel)
    o_ref[0] = z.astype(o_ref.dtype)


# ----------------------------------------------------------------------------
# Parameter setup (done once) and forward wrapper
# ----------------------------------------------------------------------------
def init_luconv(key, nchan, relu):
    """Synthetic LUconv parameters (conv weight/bias, BN stats, PReLU alpha)."""
    k = jax.random.split(key, 6)
    fan_in = 9 * nchan
    p = dict(
        w=jax.random.normal(k[0], (3, 3, nchan, nchan), jnp.float32)
          * (2.0 / fan_in) ** 0.5,
        b=0.01 * jax.random.normal(k[1], (nchan,), jnp.float32),
        gamma=1.0 + 0.1 * jax.random.normal(k[2], (nchan,), jnp.float32),
        beta=0.1 * jax.random.normal(k[3], (nchan,), jnp.float32),
        mean=0.1 * jax.random.normal(k[4], (nchan,), jnp.float32),
        var=1.0 + 0.1 * jax.random.uniform(k[5], (nchan,), jnp.float32),
        relu=relu,
    )
    if not relu:
        p['alpha'] = jnp.full((nchan,), 0.25, jnp.float32)  # PyTorch PReLU init
    return p


def prepare_luconv(p):
    """Pre-fold BN into scale/shift and pre-pad/pack weights -- ONCE, not per call."""
    _, _, cin, cout = p['w'].shape
    kp = _round_up(3 * cin, 128)       # (dj, cin) packed contraction axis
    coutp = _round_up(cout, 128)       # lane-dense output channels

    w2 = jnp.zeros((3, kp, coutp), jnp.float32)
    # w2[di, dj*cin + c, co] = w[di, dj, c, co]
    w2 = w2.at[:, :3 * cin, :cout].set(p['w'].reshape(3, 3 * cin, cout))

    scale = p['gamma'] / jnp.sqrt(p['var'] + EPS)
    shift = scale * (p['b'] - p['mean']) + p['beta']
    alpha = p.get('alpha', jnp.zeros((cout,), jnp.float32))
    pad_c = lambda v: jnp.zeros((1, coutp), jnp.float32).at[0, :cout].set(v)

    return dict(w=w2.astype(jnp.bfloat16),
                scale=pad_c(scale), shift=pad_c(shift), alpha=pad_c(alpha))


@functools.partial(jax.jit, static_argnames=("relu",))
def luconv_forward(packed, x, *, relu):
    """LUconv forward: x (N, H, W, C) f32 -> (N, H, W, C) f32."""
    n, h, w, cin = x.shape
    assert w % 8 == 0, "width must be a multiple of 8 (sublane tile)"
    cout = cin                                   # LUconv: nchan -> nchan
    kp = packed['w'].shape[1]
    coutp = packed['w'].shape[2]
    lout = (h + 2) * w                           # flattened rows incl. junk border rows
    lpad = (h + 4) * w                           # + one zero image-row front/back

    # Spatial zero-pad, pack the 3 width taps (dj) into the channel axis, flatten
    # (row, col) into one M axis, pad M by one image row on each side, cast bf16.
    xp = jnp.pad(x, ((0, 0), (1, 1), (1, 1), (0, 0)))                   # (N,H+2,W+2,C)
    xs = jnp.concatenate([xp[:, :, dj:dj + w, :] for dj in range(3)],
                         axis=-1)                                       # (N,H+2,W,3C)
    xs = xs.reshape(n, lout, 3 * cin)
    xs = jnp.pad(xs, ((0, 0), (w, w), (0, kp - 3 * cin)))               # (N,Lpad,Kp)
    xs = xs.astype(jnp.bfloat16)

    out = pl.pallas_call(
        functools.partial(_luconv_kernel, width=w, relu=relu),
        out_shape=jax.ShapeDtypeStruct((n, lout, coutp), jnp.float32),
        grid_spec=pltpu.PrefetchScalarGridSpec(
            num_scalar_prefetch=0,
            grid=(n,),
            in_specs=[
                pl.BlockSpec((1, lpad, kp), lambda i: (i, 0, 0)),
                pl.BlockSpec((3, kp, coutp), lambda i: (0, 0, 0)),
                pl.BlockSpec((1, coutp), lambda i: (0, 0)),
                pl.BlockSpec((1, coutp), lambda i: (0, 0)),
                pl.BlockSpec((1, coutp), lambda i: (0, 0)),
            ],
            out_specs=pl.BlockSpec((1, lout, coutp), lambda i: (i, 0, 0)),
        ),
        compiler_params=pltpu.CompilerParams(
            dimension_semantics=("parallel",)),
    )(xs, packed['w'], packed['scale'], packed['shift'], packed['alpha'])

    # Drop padded channels and the junk border rows, back to NHWC.
    out = out[:, :, :cout].reshape(n, h + 2, w, cout)[:, 1:h + 1, :, :]
    return out
    # TODO(synk): very large H*W would need an M-tiled (halo) pipeline instead of one
    #             whole-image block per grid step to stay within VMEM.


# ----------------------------------------------------------------------------
# Plain-JAX reference (same bf16 operand rounding, f32 accumulation)
# ----------------------------------------------------------------------------
def luconv_reference(p, x):
    y = lax.conv_general_dilated(
        x.astype(jnp.bfloat16), p['w'].astype(jnp.bfloat16),
        window_strides=(1, 1), padding=((1, 1), (1, 1)),
        dimension_numbers=('NHWC', 'HWIO', 'NHWC'),
        preferred_element_type=jnp.float32)
    scale = p['gamma'] / jnp.sqrt(p['var'] + EPS)
    shift = scale * (p['b'] - p['mean']) + p['beta']
    y = y * scale + shift
    if p['relu']:
        return jnp.maximum(y, 0.0)
    return jnp.where(y > 0.0, y, p['alpha'] * y)


if __name__ == "__main__":
    key = jax.random.PRNGKey(0)
    kpar, kpar2, kx = jax.random.split(key, 3)
    nchan = 32
    # NHWC input (2, 16, 16, 32) == PyTorch NCHW (2, 32, 16, 16)
    x = jax.random.normal(kx, (2, 16, 16, nchan), jnp.float32)

    # PReLU branch (relu=False), as used by LUconv inside AMRSegNet.
    params_p = init_luconv(kpar, nchan, relu=False)
    out_p = luconv_forward(prepare_luconv(params_p), x, relu=False)
    out_p = jax.block_until_ready(out_p)
    assert out_p.shape == x.shape, out_p.shape
    err_p = float(jnp.max(jnp.abs(out_p - luconv_reference(params_p, x))))

    # ReLU branch (relu=True).
    params_r = init_luconv(kpar2, nchan, relu=True)
    out_r = luconv_forward(prepare_luconv(params_r), x, relu=True)
    out_r = jax.block_until_ready(out_r)
    assert out_r.shape == x.shape, out_r.shape
    err_r = float(jnp.max(jnp.abs(out_r - luconv_reference(params_r, x))))

    assert err_p < 5e-2 and err_r < 5e-2, (err_p, err_r)
    print("KERNEL_OK")
</pallas_src>

<mosaic_0001>
module attributes {stable_mosaic.version = 11 : i64} {
  func.func @_luconv_kernel(%arg0: i32, %arg1: memref<1x320x128xbf16, #tpu.memory_space<vmem>>, %arg2: memref<3x128x128xbf16, #tpu.memory_space<vmem>>, %arg3: memref<1x128xf32, #tpu.memory_space<vmem>>, %arg4: memref<1x128xf32, #tpu.memory_space<vmem>>, %arg5: memref<1x128xf32, #tpu.memory_space<vmem>>, %arg6: memref<1x288x128xf32, #tpu.memory_space<vmem>>) attributes {dimension_semantics = [#tpu.dimension_semantics<parallel>], iteration_bounds = array<i64: 2>, scalar_prefetch = 0 : i64, scratch_operands = 0 : i64, tpu.core_type = #tpu.core_type<tc>, window_params = [{transform_indices = @transform_0, window_bounds = array<i64: 1, 320, 128>}, {pipeline_mode = #tpu.pipeline_mode<synchronous>, transform_indices = @transform_1, window_bounds = array<i64: 3, 128, 128>}, {pipeline_mode = #tpu.pipeline_mode<synchronous>, transform_indices = @transform_2, window_bounds = array<i64: 1, 128>}, {pipeline_mode = #tpu.pipeline_mode<synchronous>, transform_indices = @transform_3, window_bounds = array<i64: 1, 128>}, {pipeline_mode = #tpu.pipeline_mode<synchronous>, transform_indices = @transform_4, window_bounds = array<i64: 1, 128>}, {transform_indices = @transform_5, window_bounds = array<i64: 1, 288, 128>}]} {
    %cst = arith.constant 0.000000e+00 : f32
    %0 = vector.broadcast %cst : f32 to vector<288x128xf32>
    %c0 = arith.constant 0 : index
    %c0_0 = arith.constant 0 : index
    %c0_1 = arith.constant 0 : index
    %1 = vector.load %arg1[%c0, %c0_0, %c0_1] : memref<1x320x128xbf16, #tpu.memory_space<vmem>>, vector<1x288x128xbf16>
    %2 = vector.shape_cast %1 : vector<1x288x128xbf16> to vector<288x128xbf16>
    %c0_2 = arith.constant 0 : index
    %c0_3 = arith.constant 0 : index
    %c0_4 = arith.constant 0 : index
    %3 = vector.load %arg2[%c0_2, %c0_3, %c0_4] : memref<3x128x128xbf16, #tpu.memory_space<vmem>>, vector<1x128x128xbf16>
    %4 = vector.shape_cast %3 : vector<1x128x128xbf16> to vector<128x128xbf16>
    %cst_5 = arith.constant dense<0.000000e+00> : vector<288x128xf32>
    %5 = tpu.matmul %2, %4, %cst_5 {dimension_numbers = #tpu.dot_dimension_numbers<[1], [0], [0], [1], [0, 0, 1, 1], [], []>} : vector<288x128xbf16>, vector<128x128xbf16>, vector<288x128xf32> -> vector<288x128xf32>
    %6 = arith.addf %0, %5 : vector<288x128xf32>
    %c0_6 = arith.constant 0 : index
    %c16 = arith.constant 16 : index
    %c0_7 = arith.constant 0 : index
    %7 = vector.load %arg1[%c0_6, %c16, %c0_7] : memref<1x320x128xbf16, #tpu.memory_space<vmem>>, vector<1x288x128xbf16>
    %8 = vector.shape_cast %7 : vector<1x288x128xbf16> to vector<288x128xbf16>
    %c1 = arith.constant 1 : index
    %c0_8 = arith.constant 0 : index
    %c0_9 = arith.constant 0 : index
    %9 = vector.load %arg2[%c1, %c0_8, %c0_9] : memref<3x128x128xbf16, #tpu.memory_space<vmem>>, vector<1x128x128xbf16>
    %10 = vector.shape_cast %9 : vector<1x128x128xbf16> to vector<128x128xbf16>
    %cst_10 = arith.constant dense<0.000000e+00> : vector<288x128xf32>
    %11 = tpu.matmul %8, %10, %cst_10 {dimension_numbers = #tpu.dot_dimension_numbers<[1], [0], [0], [1], [0, 0, 1, 1], [], []>} : vector<288x128xbf16>, vector<128x128xbf16>, vector<288x128xf32> -> vector<288x128xf32>
    %12 = arith.addf %6, %11 : vector<288x128xf32>
    %c0_11 = arith.constant 0 : index
    %c32 = arith.constant 32 : index
    %c0_12 = arith.constant 0 : index
    %13 = vector.load %arg1[%c0_11, %c32, %c0_12] : memref<1x320x128xbf16, #tpu.memory_space<vmem>>, vector<1x288x128xbf16>
    %14 = vector.shape_cast %13 : vector<1x288x128xbf16> to vector<288x128xbf16>
    %c2 = arith.constant 2 : index
    %c0_13 = arith.constant 0 : index
    %c0_14 = arith.constant 0 : index
    %15 = vector.load %arg2[%c2, %c0_13, %c0_14] : memref<3x128x128xbf16, #tpu.memory_space<vmem>>, vector<1x128x128xbf16>
    %16 = vector.shape_cast %15 : vector<1x128x128xbf16> to vector<128x128xbf16>
    %cst_15 = arith.constant dense<0.000000e+00> : vector<288x128xf32>
    %17 = tpu.matmul %14, %16, %cst_15 {dimension_numbers = #tpu.dot_dimension_numbers<[1], [0], [0], [1], [0, 0, 1, 1], [], []>} : vector<288x128xbf16>, vector<128x128xbf16>, vector<288x128xf32> -> vector<288x128xf32>
    %18 = arith.addf %12, %17 : vector<288x128xf32>
    %c0_16 = arith.constant 0 : index
    %c0_17 = arith.constant 0 : index
    %19 = vector.load %arg3[%c0_16, %c0_17] : memref<1x128xf32, #tpu.memory_space<vmem>>, vector<1x128xf32>
    %20 = vector.broadcast %19 : vector<1x128xf32> to vector<288x128xf32>
    %21 = arith.mulf %18, %20 : vector<288x128xf32>
    %c0_18 = arith.constant 0 : index
    %c0_19 = arith.constant 0 : index
    %22 = vector.load %arg4[%c0_18, %c0_19] : memref<1x128xf32, #tpu.memory_space<vmem>>, vector<1x128xf32>
    %23 = vector.broadcast %22 : vector<1x128xf32> to vector<288x128xf32>
    %24 = arith.addf %21, %23 : vector<288x128xf32>
    %cst_20 = arith.constant 0.000000e+00 : f32
    %25 = vector.broadcast %cst_20 : f32 to vector<288x128xf32>
    %26 = arith.cmpf ogt, %24, %25 : vector<288x128xf32>
    %c0_21 = arith.constant 0 : index
    %c0_22 = arith.constant 0 : index
    %27 = vector.load %arg5[%c0_21, %c0_22] : memref<1x128xf32, #tpu.memory_space<vmem>>, vector<1x128xf32>
    %28 = vector.broadcast %27 : vector<1x128xf32> to vector<288x128xf32>
    %29 = arith.mulf %28, %24 : vector<288x128xf32>
    %30 = arith.select %26, %24, %29 : vector<288x128xi1>, vector<288x128xf32>
    %c0_23 = arith.constant 0 : index
    %c0_24 = arith.constant 0 : index
    %c0_25 = arith.constant 0 : index
    %31 = vector.load %arg6[%c0_23, %c0_24, %c0_25] : memref<1x288x128xf32, #tpu.memory_space<vmem>>, vector<1x288x128xf32>
    %32 = vector.shape_cast %31 : vector<1x288x128xf32> to vector<288x128xf32>
    %33 = vector.shape_cast %30 : vector<288x128xf32> to vector<1x288x128xf32>
    tpu.vector_store %arg6[%c0_23, %c0_24, %c0_25], %33 {strides = array<i32>} : memref<1x288x128xf32, #tpu.memory_space<vmem>>, vector<1x288x128xf32>,
    return
  }
  func.func @transform_0(%arg0: i32) -> (i32, i32, i32) {
    %c0_i32 = arith.constant 0 : i32
    %c0_i32_0 = arith.constant 0 : i32
    %c0_i32_1 = arith.constant 0 : i32
    return %arg0, %c0_i32, %c0_i32_0 : i32, i32, i32
  }
  func.func @transform_1(%arg0: i32) -> (i32, i32, i32) {
    %c0_i32 = arith.constant 0 : i32
    %c0_i32_0 = arith.constant 0 : i32
    %c0_i32_1 = arith.constant 0 : i32
    %c0_i32_2 = arith.constant 0 : i32
    return %c0_i32, %c0_i32_0, %c0_i32_1 : i32, i32, i32
  }
  func.func @transform_2(%arg0: i32) -> (i32, i32) {
    %c0_i32 = arith.constant 0 : i32
    %c0_i32_0 = arith.constant 0 : i32
    %c0_i32_1 = arith.constant 0 : i32
    return %c0_i32, %c0_i32_0 : i32, i32
  }
  func.func @transform_3(%arg0: i32) -> (i32, i32) {
    %c0_i32 = arith.constant 0 : i32
    %c0_i32_0 = arith.constant 0 : i32
    %c0_i32_1 = arith.constant 0 : i32
    return %c0_i32, %c0_i32_0 : i32, i32
  }
  func.func @transform_4(%arg0: i32) -> (i32, i32) {
    %c0_i32 = arith.constant 0 : i32
    %c0_i32_0 = arith.constant 0 : i32
    %c0_i32_1 = arith.constant 0 : i32
    return %c0_i32, %c0_i32_0 : i32, i32
  }
  func.func @transform_5(%arg0: i32) -> (i32, i32, i32) {
    %c0_i32 = arith.constant 0 : i32
    %c0_i32_0 = arith.constant 0 : i32
    %c0_i32_1 = arith.constant 0 : i32
    return %arg0, %c0_i32, %c0_i32_0 : i32, i32, i32
  }
}

</mosaic_0001>

<bundles_post_ra>
// kernel: luconv_forward.1
= control target key start
LH: loop header
LB: loop body
LE: loop exit
PB: predicated region body
PF: predicated region fallthrough
CT: control target
= control target key end

     0   :  { %s2111_s18 = smov 0   ;;  %s2470_s0 = inlined_call_operand.vmem [shape: bf16[2,320,128], index: 0, kind: input, shape index: {}]   ;;  %s2471_s1 = inlined_call_operand.vmem [shape: bf16[3,128,128], index: 1, kind: input, shape index: {}]   ;;  %s2472_s2 = inlined_call_operand.vmem [shape: f32[1,128], index: 2, kind: input, shape index: {}]   ;;  %s2473_s3 = inlined_call_operand.vmem [shape: f32[1,128], index: 3, kind: input, shape index: {}]   ;;  %s2474_s4 = inlined_call_operand.vmem [shape: f32[1,128], index: 4, kind: input, shape index: {}]   ;;  %s2475_s5 = inlined_call_operand.vmem [shape: f32[2,288,128], index: 5, kind: output, shape index: {}]  }
   0x1 LB: > { %s1575_s19 = sadd.s32 4294967295, %s2079_s18   ;;  %p1579_p0 = scmp.ge.s32.totalorder %s2079_s18, 1  ;;  %s2079_s18 = sphi %s2111_s18, %s15_s18  }
   0x2   : > { %p187_p1 = scmp.lt.s32.totalorder %s2079_s18, 3 }
   0x4   : > { %p188_p2 = pnand %p1579_p0, %p187_p1 }
   0x5   : > { %v2012_v0 = vld [vmem:[%s2471_s1 + $0x40] sm:$0xff] (!%p188_p2)   ;;  %p215_p3 = scmp.lt.s32.totalorder (!%p188_p2), %s1575_s19, 1  ;;  %v2014_v2 = vld [vmem:[%s2471_s1 + $0x48] sm:$0xff] (!%p188_p2)   ;;  %v2016_v4 = vld [vmem:[%s2471_s1 + $0x50] sm:$0xff] (!%p188_p2)  }
   0x6   : > { %191 = sbr.rel (%p188_p2) target bundleno = 367 (0x16f), region = 40  ;;  %v2013_v1 = vld [vmem:[%s2471_s1] sm:$0xff] (!%p188_p2)   ;;  %1758 = vmatprep.subr.bf16.mxu1 (!%p188_p2), %v2012_v0  ;;  %v2131_v3 = vld [vmem:[%s2471_s1 + $0x8] sm:$0xff] (!%p188_p2)   ;;  %v2140_v5 = vld [vmem:[%s2471_s1 + $0x10] sm:$0xff] (!%p188_p2)  }
   0x7   : > { %1810 = vmatprep.subr.bf16.mxu0 (!%p188_p2), %v2013_v1  ;;  %1759 = vmatpush3.bf16.msra.mxu1 (!%p188_p2), %v2012_v0  ;;  %v2018_v6 = vld [vmem:[%s2471_s1 + $0x58] sm:$0xff] (!%p188_p2)   ;;  %v2020_v8 = vld [vmem:[%s2471_s1 + $0x60] sm:$0xff] (!%p188_p2)   ;;  %v2022_v10 = vld [vmem:[%s2471_s1 + $0x68] sm:$0xff] (!%p188_p2)  }
   0x8   : > { %1811 = vmatpush3.bf16.msra.mxu0 (!%p188_p2), %v2013_v1  ;;  %1760 = vmatprep.subr.bf16.mxu1 (!%p188_p2), %v2014_v2  ;;  %v2152_v7 = vld [vmem:[%s2471_s1 + $0x18] sm:$0xff] (!%p188_p2)   ;;  %v2163_v9 = vld [vmem:[%s2471_s1 + $0x20] sm:$0xff] (!%p188_p2)   ;;  %v2176_v11 = vld [vmem:[%s2471_s1 + $0x28] sm:$0xff] (!%p188_p2)  }
   0x9   : > { %1812 = vmatprep.subr.bf16.mxu0 (!%p188_p2), %v2131_v3  ;;  %v2024_v14 = vld [vmem:[%s2471_s1 + $0x70] sm:$0xff] (!%p188_p2)   ;;  %v2026_v16 = vld [vmem:[%s2471_s1 + $0x78] sm:$0xff] (!%p188_p2)   ;;  %v2031_v18 = vld [vmem:[%s2471_s1 + $0x80] sm:$0xff] (!%p188_p2)  }
   0xa   : > { %v2190_v15 = vld [vmem:[%s2471_s1 + $0x30] sm:$0xff] (!%p188_p2)   ;;  %v2200_v17 = vld [vmem:[%s2471_s1 + $0x38] sm:$0xff] (!%p188_p2)   ;;  %v2032_v21 = vld [vmem:[%s2471_s1 + $0x88] sm:$0xff] (!%p188_p2)  }
   0xb   : > { %1761 = vmatpush3.bf16.msra.mxu1 (!%p188_p2), %v2014_v2  ;;  %v2035_v22 = vld [vmem:[%s2471_s1 + $0x90] sm:$0xff] (!%p188_p2)   ;;  %v2036_v25 = vld [vmem:[%s2471_s1 + $0x98] sm:$0xff] (!%p188_p2)   ;;  %v2039_v26 = vld [vmem:[%s2471_s1 + $0xa0] sm:$0xff] (!%p188_p2)  }
   0xc   : > { %1813 = vmatpush3.bf16.msra.mxu0 (!%p188_p2), %v2131_v3  ;;  %1762 = vmatprep.subr.bf16.mxu1 (!%p188_p2), %v2016_v4  ;;  %v2040_v29 = vld [vmem:[%s2471_s1 + $0xa8] sm:$0xff] (!%p188_p2)   ;;  %v2043_v30 = vld [vmem:[%s2471_s1 + $0xb0] sm:$0xff] (!%p188_p2)   ;;  %v2044_v34 = vld [vmem:[%s2471_s1 + $0xb8] sm:$0xff] (!%p188_p2)  }
   0xd   : > { %s2477_s19 = smov (!%p215_p3, %s1575_s19), 1  ;;  %1814 = vmatprep.subr.bf16.mxu0 %v2140_v5 }
   0xe   : > { %s2002_s11 = smul.u32 160, %s2477_s19 }
   0xf   : > { %1763 = vmatpush3.bf16.msra.mxu1 %v2016_v4  ;;  %s2003_s30 = smul.u32 288, %s2477_s19 }
  0x10   : > { %1815 = vmatpush3.bf16.msra.mxu0 %v2140_v5  ;;  %1764 = vmatprep.subr.bf16.mxu1 %v2018_v6  ;;  %s2168_s20 = scalar_lea.vmem %s2470_s0, %s2002_s11 }
  0x11   : > { %1816 = vmatprep.subr.bf16.mxu0 %v2152_v7  ;;  %v2028_v12 = vld [vmem:[%s2168_s20 + $0x8] sm:$0xff]   ;;  %v2029_v13 = vld [vmem:[%s2168_s20] sm:$0xff]   ;;  %v2030_v19 = vld [vmem:[%s2168_s20 + $0x10] sm:$0xff]   ;;  %s2319_s9 = scalar_lea.vmem %s2475_s5, %s2003_s30 }
  0x12   : > { %1774 = vmatprep.mubr.bf16.mxu1 %v2028_v12  ;;  %1826 = vmatprep.mubr.bf16.mxu0 %v2029_v13  ;;  %v2033_v20 = vld [vmem:[%s2168_s20 + $0x18] sm:$0xff]   ;;  %v2034_v23 = vld [vmem:[%s2168_s20 + $0x20] sm:$0xff]   ;;  %v2037_v24 = vld [vmem:[%s2168_s20 + $0x28] sm:$0xff]  }
  0x13   : > { %1765 = vmatpush3.bf16.msra.mxu1 %v2018_v6  ;;  %v2038_v27 = vld [vmem:[%s2168_s20 + $0x30] sm:$0xff]   ;;  %v2041_v28 = vld [vmem:[%s2168_s20 + $0x38] sm:$0xff]   ;;  %v2042_v31 = vld [vmem:[%s2168_s20 + $0x40] sm:$0xff]  }
  0x14   : > { %1817 = vmatpush3.bf16.msra.mxu0 %v2152_v7  ;;  %1766 = vmatprep.subr.bf16.mxu1 %v2020_v8  ;;  %v2045_v32 = vld [vmem:[%s2168_s20 + $0x48] sm:$0xff]   ;;  %v2046_v33 = vld [vmem:[%s2168_s20 + $0x10] sm:$0xff]   ;;  %v2048_v36 = vld [vmem:[%s2168_s20 + $0x18] sm:$0xff]  }
  0x15   : > { %1818 = vmatprep.subr.bf16.mxu0 %v2163_v9  ;;  %v2047_v35 = vld [vmem:[%s2168_s20 + $0x50] sm:$0xff]   ;;  %v2049_v37 = vld [vmem:[%s2168_s20 + $0x58] sm:$0xff]   ;;  %v2050_v38 = vld [vmem:[%s2168_s20 + $0x20] sm:$0xff]  }
  0x16   : > { %v2051_v39 = vld [vmem:[%s2168_s20 + $0x60] sm:$0xff]   ;;  %v2052_v40 = vld [vmem:[%s2168_s20 + $0x28] sm:$0xff]   ;;  %v2054_v42 = vld [vmem:[%s2168_s20 + $0x30] sm:$0xff]  }
  0x17   : > { %1767 = vmatpush3.bf16.msra.mxu1 %v2020_v8  ;;  %v2053_v41 = vld [vmem:[%s2168_s20 + $0x68] sm:$0xff]   ;;  %v2055_v43 = vld [vmem:[%s2168_s20 + $0x70] sm:$0xff]   ;;  %v2056_v44 = vld [vmem:[%s2168_s20 + $0x38] sm:$0xff]  }
  0x18   : > { %1819 = vmatpush3.bf16.msra.mxu0 %v2163_v9  ;;  %1768 = vmatprep.subr.bf16.mxu1 %v2022_v10  ;;  %v2057_v45 = vld [vmem:[%s2168_s20 + $0x78] sm:$0xff]   ;;  %v2058_v46 = vld [vmem:[%s2168_s20 + $0x40] sm:$0xff]   ;;  %v2060_v48 = vld [vmem:[%s2168_s20 + $0x48] sm:$0xff]  }
  0x19   : > { %1820 = vmatprep.subr.bf16.mxu0 %v2176_v11  ;;  %v2059_v47 = vld [vmem:[%s2168_s20 + $0x80] sm:$0xff]   ;;  %v2061_v49 = vld [vmem:[%s2168_s20 + $0x88] sm:$0xff]   ;;  %v2063_v50 = vld [vmem:[%s2168_s20 + $0x50] sm:$0xff]  }
  0x1a   : > { %v2062_v51 = vld [vmem:[%s2168_s20 + $0x90] sm:$0xff]   ;;  %v2064_v52 = vld [vmem:[%s2168_s20 + $0x58] sm:$0xff]   ;;  %v2065_v53 = vld [vmem:[%s2168_s20 + $0x60] sm:$0xff]  }
  0x1b   : > { %1769 = vmatpush3.bf16.msra.mxu1 %v2022_v10  ;;  %v2066_v54 = vld [vmem:[%s2168_s20 + $0x68] sm:$0xff]   ;;  %v2067_v55 = vld [vmem:[%s2168_s20 + $0x70] sm:$0xff]   ;;  %v2068_v56 = vld [vmem:[%s2168_s20 + $0x78] sm:$0xff]  }
  0x1c   : > { %1821 = vmatpush3.bf16.msra.mxu0 %v2176_v11  ;;  %1770 = vmatprep.subr.bf16.mxu1 %v2024_v14  ;;  %v2069_v57 = vld [vmem:[%s2168_s20 + $0x80] sm:$0xff]   ;;  %v2070_v58 = vld [vmem:[%s2168_s20 + $0x88] sm:$0xff]   ;;  %v2071_v59 = vld [vmem:[%s2168_s20 + $0x90] sm:$0xff]  }
  0x1d   : > { %1822 = vmatprep.subr.bf16.mxu0 %v2190_v15  ;;  %v2072_v60 = vld [vmem:[%s2168_s20 + $0x98] sm:$0xff]  }
  0x1f   : > { %1771 = vmatpush3.bf16.msra.mxu1 %v2024_v14  ;;  %v2297_v14 = vld [vmem:[%s2472_s2] ss:$0 sm:$0xff] }
  0x20   : > { %1823 = vmatpush3.bf16.msra.mxu0 %v2190_v15  ;;  %1772 = vmatprep.subr.bf16.mxu1 %v2026_v16 }
  0x21   : > { %1824 = vmatprep.subr.bf16.mxu0 %v2200_v17 }
  0x23   : > { %1773 = vmatpush3.bf16.msra.mxu1 %v2026_v16 }
  0x24   : > { %1825 = vmatpush3.bf16.msra.mxu0 %v2200_v17  ;;  %1914 = vmatprep.subr.bf16.mxu1 %v2013_v1 }
  0x25   : > { %1862 = vmatprep.subr.bf16.mxu0 %v2031_v18 }
  0x26   : > { %1775 = vmatmul.mubr.bf16.vlgmr.msra.gmra.mrb[0].mxu1 %v2030_v19 }
  0x27   : > { %1827 = vmatmul.mubr.bf16.vlgmr.msra.gmra.mrb[0].mxu0 %v2028_v12  ;;  %1922 = vmatpush3.bf16.msra.mxu1 %v2013_v1 }
  0x28   : > { %1863 = vmatpush3.bf16.msra.mxu0 %v2031_v18  ;;  %1778 = vmatprep.mubr.bf16.mxu1 %v2033_v20 }
  0x29   : > { %1864 = vmatprep.subr.bf16.mxu0 %v2032_v21  ;;  %1830 = vmatprep.mubr.bf16.mxu0 %v2030_v19 }
  0x2a   : > { %1915 = vmatprep.subr.bf16.mxu1 %v2131_v3 }
  0x2b   : > { %1923 = vmatpush3.bf16.msra.mxu1 %v2131_v3 }
  0x2c   : > { %1865 = vmatpush3.bf16.msra.mxu0 %v2032_v21  ;;  %1916 = vmatprep.subr.bf16.mxu1 %v2140_v5 }
  0x2d   : > { %1866 = vmatprep.subr.bf16.mxu0 %v2035_v22 }
  0x2e   : > { %1779 = vmatmul.mubr.bf16.gmra.mrb[4].mxu1 %v2034_v23 }
  0x2f   : > { %1831 = vmatmul.mubr.bf16.gmra.mrb[4].mxu0 %v2033_v20  ;;  %1782 = vmatprep.mubr.bf16.mxu1 %v2037_v24 }
  0x30   : > { %1867 = vmatpush3.bf16.msra.mxu0 %v2035_v22  ;;  %1834 = vmatprep.mubr.bf16.mxu0 %v2034_v23  ;;  %v2309_v23 = vld [vmem:[%s2474_s4] ss:$0 sm:$0xff] }
  0x31   : > { %1868 = vmatprep.subr.bf16.mxu0 %v2036_v25  ;;  %1924 = vmatpush3.bf16.msra.mxu1 %v2140_v5 }
  0x32   : > { %1917 = vmatprep.subr.bf16.mxu1 %v2152_v7 }
  0x34   : > { %1869 = vmatpush3.bf16.msra.mxu0 %v2036_v25 }
  0x35   : > { %1870 = vmatprep.subr.bf16.mxu0 %v2039_v26  ;;  %1925 = vmatpush3.bf16.msra.mxu1 %v2152_v7 }
  0x36   : > { %1783 = vmatmul.mubr.bf16.gmra.mrb[8].mxu1 %v2038_v27  ;;  %1918 = vmatprep.subr.bf16.mxu1 %v2163_v9 }
  0x37   : > { %1835 = vmatmul.mubr.bf16.gmra.mrb[8].mxu0 %v2037_v24  ;;  %1786 = vmatprep.mubr.bf16.mxu1 %v2041_v28 }
  0x38   : > { %1871 = vmatpush3.bf16.msra.mxu0 %v2039_v26  ;;  %1838 = vmatprep.mubr.bf16.mxu0 %v2038_v27 }
  0x39   : > { %1872 = vmatprep.subr.bf16.mxu0 %v2040_v29  ;;  %1926 = vmatpush3.bf16.msra.mxu1 %v2163_v9 }
  0x3a   : > { %1919 = vmatprep.subr.bf16.mxu1 %v2176_v11 }
  0x3c   : > { %1873 = vmatpush3.bf16.msra.mxu0 %v2040_v29 }
  0x3d   : > { %1874 = vmatprep.subr.bf16.mxu0 %v2043_v30  ;;  %1927 = vmatpush3.bf16.msra.mxu1 %v2176_v11 }
  0x3e   : > { %1787 = vmatmul.mubr.bf16.gmra.mrb[12].mxu1 %v2042_v31  ;;  %1920 = vmatprep.subr.bf16.mxu1 %v2190_v15 }
  0x3f   : > { %1839 = vmatmul.mubr.bf16.gmra.mrb[12].mxu0 %v2041_v28  ;;  %1790 = vmatprep.mubr.bf16.mxu1 %v2045_v32 }
  0x40   : > { %1875 = vmatpush3.bf16.msra.mxu0 %v2043_v30  ;;  %1878 = vmatprep.mubr.bf16.mxu0 %v2046_v33 }
  0x41   : > { %1876 = vmatprep.subr.bf16.mxu0 %v2044_v34  ;;  %1928 = vmatpush3.bf16.msra.mxu1 %v2190_v15 }
  0x42   : > { %1921 = vmatprep.subr.bf16.mxu1 %v2200_v17 }
  0x44   : > { %1877 = vmatpush3.bf16.msra.mxu0 %v2044_v34 }
  0x45   : > { %1929 = vmatpush3.bf16.msra.mxu1 %v2200_v17  ;;  %v2302_v17 = vld [vmem:[%s2473_s3] ss:$0 sm:$0xff] }
  0x46   : > { %1791 = vmatmul.mubr.bf16.gmra.mrb[16].mxu1 %v2047_v35 }
  0x47   : > { %1879 = vmatmul.mubr.bf16.vlgmr.msra.gmra.mrb[0].mxu0 %v2048_v36  ;;  %1794 = vmatprep.mubr.bf16.mxu1 %v2049_v37 }
  0x48   : > { %1882 = vmatprep.mubr.bf16.mxu0 %v2050_v38 }
  0x4e   : > { %1795 = vmatmul.mubr.bf16.gmra.mrb[20].mxu1 %v2051_v39 }
  0x4f   : > { %1883 = vmatmul.mubr.bf16.gmra.mrb[4].mxu0 %v2052_v40  ;;  %1798 = vmatprep.mubr.bf16.mxu1 %v2053_v41 }
  0x50   : > { %1886 = vmatprep.mubr.bf16.mxu0 %v2054_v42 }
  0x56   : > { %1799 = vmatmul.mubr.bf16.gmra.mrb[24].mxu1 %v2055_v43 }
  0x57   : > { %1887 = vmatmul.mubr.bf16.gmra.mrb[8].mxu0 %v2056_v44  ;;  %1802 = vmatprep.mubr.bf16.mxu1 %v2057_v45 }
  0x58   : > { %1890 = vmatprep.mubr.bf16.mxu0 %v2058_v46 }
  0x5e   : > { %1803 = vmatmul.mubr.bf16.gmra.mrb[28].mxu1 %v2059_v47 }
  0x5f   : > { %1891 = vmatmul.mubr.bf16.gmra.mrb[12].mxu0 %v2060_v48  ;;  %1806 = vmatprep.mubr.bf16.mxu1 %v2061_v49 }
  0x60   : > { %1894 = vmatprep.mubr.bf16.mxu0 %v2063_v50 }
  0x66   : > { %1807 = vmatmul.mubr.bf16.gmra.mrb[32].mxu1 %v2062_v51 }
  0x67   : > { %1895 = vmatmul.mubr.bf16.gmra.mrb[16].mxu0 %v2064_v52  ;;  %1842 = vmatprep.mubr.bf16.mxu1 %v2042_v31 }
  0x68   : > { %1898 = vmatprep.mubr.bf16.mxu0 %v2065_v53 }
  0x6e   : > { %1843 = vmatmul.mubr.bf16.vlgmr.msra.gmra.mrb[16].mxu1 %v2045_v32 }
  0x6f   : > { %1899 = vmatmul.mubr.bf16.gmra.mrb[20].mxu0 %v2066_v54  ;;  %1846 = vmatprep.mubr.bf16.mxu1 %v2047_v35 }
  0x70   : > { %1902 = vmatprep.mubr.bf16.mxu0 %v2067_v55 }
  0x76   : > { %1847 = vmatmul.mubr.bf16.gmra.mrb[20].mxu1 %v2049_v37 }
  0x77   : > { %1903 = vmatmul.mubr.bf16.gmra.mrb[24].mxu0 %v2068_v56  ;;  %1850 = vmatprep.mubr.bf16.mxu1 %v2051_v39 }
  0x78   : > { %1906 = vmatprep.mubr.bf16.mxu0 %v2069_v57 }
  0x7e   : > { %1851 = vmatmul.mubr.bf16.gmra.mrb[24].mxu1 %v2053_v41 }
  0x7f   : > { %1907 = vmatmul.mubr.bf16.gmra.mrb[28].mxu0 %v2070_v58  ;;  %1854 = vmatprep.mubr.bf16.mxu1 %v2055_v43 }
  0x80   : > { %1910 = vmatprep.mubr.bf16.mxu0 %v2071_v59 }
  0x86   : > { %1855 = vmatmul.mubr.bf16.gmra.mrb[28].mxu1 %v2057_v45 }
  0x87   : > { %1911 = vmatmul.mubr.bf16.gmra.mrb[32].mxu0 %v2072_v60  ;;  %1858 = vmatprep.mubr.bf16.mxu1 %v2059_v47 }
  0x8e   : > { %1859 = vmatmul.mubr.bf16.gmra.mrb[32].mxu1 %v2061_v49 }
  0xf9   : > { %v1776_v61 = vpop.f32.mrb[0].mxu1 }
  0xfa   : > { %v487_v62 = vpop.f32.mrb[1].mxu1 }
  0xfb   : > { %v1777_v63 = vpop.f32.mrb[2].mxu1 }
  0xfc   : > { %v490_v0 = vpop.f32.mrb[3].mxu1 }
 0x101   : > { %v1780_v1 = vpop.f32.mrb[4].mxu1 }
 0x102   : > { %v503_v2 = vpop.f32.mrb[5].mxu1 }
 0x103   : > { %v1781_v3 = vpop.f32.mrb[6].mxu1 }
 0x104   : > { %v506_v4 = vpop.f32.mrb[7].mxu1 }
 0x109   : > { %v2278_v5 = vpop.f32.mrb[8].mxu1 }
 0x10a   : > { %v2280_v6 = vpop.f32.mrb[9].mxu1 }
 0x10b   : > { %v2282_v7 = vpop.f32.mrb[10].mxu1 }
 0x10c   : > { %v2284_v8 = vpop.f32.mrb[11].mxu1 }
 0x111   : > { %v2286_v9 = vpop.f32.mrb[12].mxu1 }
 0x112   : > { %v2288_v10 = vpop.f32.mrb[13].mxu1 }
 0x113   : > { %v2290_v11 = vpop.f32.mrb[14].mxu1 }
 0x114   : > { %v2292_v12 = vpop.f32.mrb[15].mxu1 }
 0x11a   : > { %v1880_v13 = vpop.f32.mrb[0].mxu0 }
 0x11b   : > { %v1930_v15 = vadd.f32 %v1880_v13, %v1776_v61  ;;  %v1104_v16 = vpop.f32.mrb[1].mxu0 }
 0x11c   : > { %v1931_v18 = vadd.f32 %v1104_v16, %v487_v62  ;;  %v1881_v19 = vpop.f32.mrb[2].mxu0 }
 0x11d   : > { %v1292_v20 = vmul.f32 %v1930_v15, %v2297_v14  ;;  %v1932_v21 = vadd.f32 %v1881_v19, %v1777_v63  ;;  %v1107_v22 = vpop.f32.mrb[3].mxu0 }
 0x11e   : > { %v1290_v24 = vmul.f32 %v1931_v18, %v2297_v14  ;;  %v1933_v25 = vadd.f32 %v1107_v22, %v490_v0 }
 0x11f   : > { %v1335_v26 = vadd.f32 %v2302_v17, %v1292_v20  ;;  %v1293_v27 = vmul.f32 %v1932_v21, %v2297_v14 }
 0x120   : > { %v1333_v28 = vadd.f32 %v2302_v17, %v1290_v24  ;;  %v1291_v29 = vmul.f32 %v1933_v25, %v2297_v14 }
 0x121   : > { %vm1371_vm0 = vcmp.gt.f32.partialorder %v1335_v26, 0.0  ;;  %v1414_v30 = vmul.f32 %v2309_v23, %v1335_v26  ;;  %v1336_v31 = vadd.f32 %v2302_v17, %v1293_v27 }
 0x122   : > { %vm1369_vm1 = vcmp.gt.f32.partialorder %v1333_v28, 0.0  ;;  %v1412_v32 = vmul.f32 %v2309_v23, %v1333_v28  ;;  %v1334_v33 = vadd.f32 %v2302_v17, %v1291_v29  ;;  %v1884_v34 = vpop.f32.mrb[4].mxu0 }
 0x123   : > { %v1450_v35 = vsel %vm1371_vm0, %v1335_v26, %v1414_v30  ;;  %vm1372_vm2 = vcmp.gt.f32.partialorder %v1336_v31, 0.0  ;;  %v1415_v36 = vmul.f32 %v2309_v23, %v1336_v31  ;;  %v1934_v37 = vadd.f32 %v1884_v34, %v1780_v1  ;;  %v1120_v38 = vpop.f32.mrb[5].mxu0 }
 0x124   : > { %1486 = vst [vmem:[%s2319_s9 + $0x10] sm:$0xff] %v1450_v35  ;;  %v1448_v39 = vsel %vm1369_vm1, %v1333_v28, %v1412_v32  ;;  %vm1370_vm3 = vcmp.gt.f32.partialorder %v1334_v33, 0.0  ;;  %v1413_v40 = vmul.f32 %v2309_v23, %v1334_v33  ;;  %v1935_v41 = vadd.f32 %v1120_v38, %v503_v2  ;;  %v1885_v42 = vpop.f32.mrb[6].mxu0 }
 0x125   : > { %1484 = vst [vmem:[%s2319_s9] sm:$0xff] %v1448_v39  ;;  %v1451_v43 = vsel %vm1372_vm2, %v1336_v31, %v1415_v36  ;;  %v1296_v44 = vmul.f32 %v1934_v37, %v2297_v14  ;;  %v1936_v45 = vadd.f32 %v1885_v42, %v1781_v3  ;;  %v1123_v46 = vpop.f32.mrb[7].mxu0 }
 0x126   : > { %1487 = vst [vmem:[%s2319_s9 + $0x18] sm:$0xff] %v1451_v43  ;;  %v1449_v47 = vsel %vm1370_vm3, %v1334_v33, %v1413_v40  ;;  %v1294_v48 = vmul.f32 %v1935_v41, %v2297_v14  ;;  %v1937_v49 = vadd.f32 %v1123_v46, %v506_v4 }
 0x127   : > { %1485 = vst [vmem:[%s2319_s9 + $0x8] sm:$0xff] %v1449_v47  ;;  %v1339_v50 = vadd.f32 %v2302_v17, %v1296_v44  ;;  %v1297_v51 = vmul.f32 %v1936_v45, %v2297_v14 }
 0x128   : > { %v1337_v52 = vadd.f32 %v2302_v17, %v1294_v48  ;;  %v1295_v53 = vmul.f32 %v1937_v49, %v2297_v14 }
 0x129   : > { %vm1375_vm4 = vcmp.gt.f32.partialorder %v1339_v50, 0.0  ;;  %v1418_v54 = vmul.f32 %v2309_v23, %v1339_v50  ;;  %v1340_v55 = vadd.f32 %v2302_v17, %v1297_v51 }
 0x12a   : > { %vm1373_vm5 = vcmp.gt.f32.partialorder %v1337_v52, 0.0  ;;  %v1416_v56 = vmul.f32 %v2309_v23, %v1337_v52  ;;  %v1338_v57 = vadd.f32 %v2302_v17, %v1295_v53  ;;  %v1888_v58 = vpop.f32.mrb[8].mxu0 }
 0x12b   : > { %v1454_v59 = vsel %vm1375_vm4, %v1339_v50, %v1418_v54  ;;  %vm1376_vm6 = vcmp.gt.f32.partialorder %v1340_v55, 0.0  ;;  %v1419_v60 = vmul.f32 %v2309_v23, %v1340_v55  ;;  %v1938_v61 = vadd.f32 %v1888_v58, %v2278_v5  ;;  %v1136_v62 = vpop.f32.mrb[9].mxu0 }
 0x12c   : > { %1490 = vst [vmem:[%s2319_s9 + $0x30] sm:$0xff] %v1454_v59  ;;  %v1452_v63 = vsel %vm1373_vm5, %v1337_v52, %v1416_v56  ;;  %vm1374_vm7 = vcmp.gt.f32.partialorder %v1338_v57, 0.0  ;;  %v1417_v0 = vmul.f32 %v2309_v23, %v1338_v57  ;;  %v1939_v1 = vadd.f32 %v1136_v62, %v2280_v6  ;;  %v1889_v2 = vpop.f32.mrb[10].mxu0 }
 0x12d   : > { %1488 = vst [vmem:[%s2319_s9 + $0x20] sm:$0xff] %v1452_v63  ;;  %v1455_v3 = vsel %vm1376_vm6, %v1340_v55, %v1419_v60  ;;  %v1300_v4 = vmul.f32 %v1938_v61, %v2297_v14  ;;  %v1940_v13 = vadd.f32 %v1889_v2, %v2282_v7  ;;  %v1139_v15 = vpop.f32.mrb[11].mxu0 }
 0x12e   : > { %1491 = vst [vmem:[%s2319_s9 + $0x38] sm:$0xff] %v1455_v3  ;;  %v1453_v16 = vsel %vm1374_vm7, %v1338_v57, %v1417_v0  ;;  %v1298_v5 = vmul.f32 %v1939_v1, %v2297_v14  ;;  %v1941_v18 = vadd.f32 %v1139_v15, %v2284_v8 }
 0x12f   : > { %1489 = vst [vmem:[%s2319_s9 + $0x28] sm:$0xff] %v1453_v16  ;;  %v1343_v19 = vadd.f32 %v2302_v17, %v1300_v4  ;;  %v1301_v6 = vmul.f32 %v1940_v13, %v2297_v14 }
 0x130   : > { %v1341_v20 = vadd.f32 %v2302_v17, %v1298_v5  ;;  %v1299_v21 = vmul.f32 %v1941_v18, %v2297_v14 }
 0x131   : > { %vm1379_vm8 = vcmp.gt.f32.partialorder %v1343_v19, 0.0  ;;  %v1422_v7 = vmul.f32 %v2309_v23, %v1343_v19  ;;  %v1344_v22 = vadd.f32 %v2302_v17, %v1301_v6 }
 0x132   : > { %vm1377_vm9 = vcmp.gt.f32.partialorder %v1341_v20, 0.0  ;;  %v1420_v24 = vmul.f32 %v2309_v23, %v1341_v20  ;;  %v1342_v8 = vadd.f32 %v2302_v17, %v1299_v21  ;;  %v1892_v25 = vpop.f32.mrb[12].mxu0 }
 0x133   : > { %v1458_v26 = vsel %vm1379_vm8, %v1343_v19, %v1422_v7  ;;  %vm1380_vm10 = vcmp.gt.f32.partialorder %v1344_v22, 0.0  ;;  %v1423_v27 = vmul.f32 %v2309_v23, %v1344_v22  ;;  %v1942_v28 = vadd.f32 %v1892_v25, %v2286_v9  ;;  %v1152_v29 = vpop.f32.mrb[13].mxu0 }
 0x134   : > { %1494 = vst [vmem:[%s2319_s9 + $0x50] sm:$0xff] %v1458_v26  ;;  %v1456_v30 = vsel %vm1377_vm9, %v1341_v20, %v1420_v24  ;;  %vm1378_vm11 = vcmp.gt.f32.partialorder %v1342_v8, 0.0  ;;  %v1421_v31 = vmul.f32 %v2309_v23, %v1342_v8  ;;  %v1943_v32 = vadd.f32 %v1152_v29, %v2288_v10  ;;  %v1893_v33 = vpop.f32.mrb[14].mxu0 }
 0x135   : > { %1492 = vst [vmem:[%s2319_s9 + $0x40] sm:$0xff] %v1456_v30  ;;  %v1459_v34 = vsel %vm1380_vm10, %v1344_v22, %v1423_v27  ;;  %v1304_v35 = vmul.f32 %v1942_v28, %v2297_v14  ;;  %v1944_v36 = vadd.f32 %v1893_v33, %v2290_v11  ;;  %v1155_v37 = vpop.f32.mrb[15].mxu0 }
 0x136   : > { %1495 = vst [vmem:[%s2319_s9 + $0x58] sm:$0xff] %v1459_v34  ;;  %v1457_v38 = vsel %vm1378_vm11, %v1342_v8, %v1421_v31  ;;  %v1302_v9 = vmul.f32 %v1943_v32, %v2297_v14  ;;  %v1945_v39 = vadd.f32 %v1155_v37, %v2292_v12 }
 0x137   : > { %1493 = vst [vmem:[%s2319_s9 + $0x48] sm:$0xff] %v1457_v38  ;;  %v1347_v40 = vadd.f32 %v2302_v17, %v1304_v35  ;;  %v1305_v10 = vmul.f32 %v1944_v36, %v2297_v14 }
 0x138   : > { %v1345_v41 = vadd.f32 %v2302_v17, %v1302_v9  ;;  %v1303_v42 = vmul.f32 %v1945_v39, %v2297_v14 }
 0x139   : > { %vm1383_vm12 = vcmp.gt.f32.partialorder %v1347_v40, 0.0  ;;  %v1426_v11 = vmul.f32 %v2309_v23, %v1347_v40  ;;  %v1348_v43 = vadd.f32 %v2302_v17, %v1305_v10 }
 0x13a   : > { %vm1381_vm13 = vcmp.gt.f32.partialorder %v1345_v41, 0.0  ;;  %v1424_v12 = vmul.f32 %v2309_v23, %v1345_v41  ;;  %v1346_v44 = vadd.f32 %v2302_v17, %v1303_v42  ;;  %v1896_v45 = vpop.f32.mrb[16].mxu0 }
 0x13b   : > { %v1462_v46 = vsel %vm1383_vm12, %v1347_v40, %v1426_v11  ;;  %vm1384_vm14 = vcmp.gt.f32.partialorder %v1348_v43, 0.0  ;;  %v1427_v47 = vmul.f32 %v2309_v23, %v1348_v43  ;;  %v1168_v48 = vpop.f32.mrb[17].mxu0 }
 0x13c   : > { %1498 = vst [vmem:[%s2319_s9 + $0x70] sm:$0xff] %v1462_v46  ;;  %v1460_v49 = vsel %vm1381_vm13, %v1345_v41, %v1424_v12  ;;  %vm1382_vm15 = vcmp.gt.f32.partialorder %v1346_v44, 0.0  ;;  %v1425_v50 = vmul.f32 %v2309_v23, %v1346_v44  ;;  %v1897_v51 = vpop.f32.mrb[18].mxu0 }
 0x13d   : > { %1496 = vst [vmem:[%s2319_s9 + $0x60] sm:$0xff] %v1460_v49  ;;  %v1463_v52 = vsel %vm1384_vm14, %v1348_v43, %v1427_v47  ;;  %v1171_v53 = vpop.f32.mrb[19].mxu0 }
 0x13e   : > { %1499 = vst [vmem:[%s2319_s9 + $0x78] sm:$0xff] %v1463_v52  ;;  %v1461_v54 = vsel %vm1382_vm15, %v1346_v44, %v1425_v50 }
 0x13f   : > { %1497 = vst [vmem:[%s2319_s9 + $0x68] sm:$0xff] %v1461_v54 }
 0x141   : > { %v1844_v55 = vpop.f32.mrb[16].mxu1 }
 0x142   : > { %v1946_v56 = vadd.f32 %v1896_v45, %v1844_v55  ;;  %v782_v57 = vpop.f32.mrb[17].mxu1  ;;  %v1900_v58 = vpop.f32.mrb[20].mxu0 }
 0x143   : > { %v1947_v59 = vadd.f32 %v1168_v48, %v782_v57  ;;  %v1845_v60 = vpop.f32.mrb[18].mxu1  ;;  %v1184_v61 = vpop.f32.mrb[21].mxu0 }
 0x144   : > { %v1308_v62 = vmul.f32 %v1946_v56, %v2297_v14  ;;  %v1948_v63 = vadd.f32 %v1897_v51, %v1845_v60  ;;  %v785_v0 = vpop.f32.mrb[19].mxu1  ;;  %v1901_v1 = vpop.f32.mrb[22].mxu0 }
 0x145   : > { %v1306_v2 = vmul.f32 %v1947_v59, %v2297_v14  ;;  %v1949_v3 = vadd.f32 %v1171_v53, %v785_v0  ;;  %v1187_v4 = vpop.f32.mrb[23].mxu0 }
 0x146   : > { %v1351_v13 = vadd.f32 %v2302_v17, %v1308_v62  ;;  %v1309_v15 = vmul.f32 %v1948_v63, %v2297_v14 }
 0x147   : > { %v1349_v16 = vadd.f32 %v2302_v17, %v1306_v2  ;;  %v1307_v5 = vmul.f32 %v1949_v3, %v2297_v14 }
 0x148   : > { %vm1387_vm0 = vcmp.gt.f32.partialorder %v1351_v13, 0.0  ;;  %v1430_v18 = vmul.f32 %v2309_v23, %v1351_v13  ;;  %v1352_v19 = vadd.f32 %v2302_v17, %v1309_v15 }
 0x149   : > { %vm1385_vm1 = vcmp.gt.f32.partialorder %v1349_v16, 0.0  ;;  %v1428_v6 = vmul.f32 %v2309_v23, %v1349_v16  ;;  %v1350_v20 = vadd.f32 %v2302_v17, %v1307_v5  ;;  %v1848_v21 = vpop.f32.mrb[20].mxu1 }
 0x14a   : > { %v1466_v7 = vsel %vm1387_vm0, %v1351_v13, %v1430_v18  ;;  %vm1388_vm2 = vcmp.gt.f32.partialorder %v1352_v19, 0.0  ;;  %v1431_v22 = vmul.f32 %v2309_v23, %v1352_v19  ;;  %v1950_v24 = vadd.f32 %v1900_v58, %v1848_v21  ;;  %v798_v8 = vpop.f32.mrb[21].mxu1  ;;  %v1904_v25 = vpop.f32.mrb[24].mxu0 }
 0x14b   : > { %1502 = vst [vmem:[%s2319_s9 + $0x90] sm:$0xff] %v1466_v7  ;;  %v1464_v26 = vsel %vm1385_vm1, %v1349_v16, %v1428_v6  ;;  %vm1386_vm3 = vcmp.gt.f32.partialorder %v1350_v20, 0.0  ;;  %v1429_v27 = vmul.f32 %v2309_v23, %v1350_v20  ;;  %v1951_v28 = vadd.f32 %v1184_v61, %v798_v8  ;;  %v1849_v29 = vpop.f32.mrb[22].mxu1  ;;  %v1200_v30 = vpop.f32.mrb[25].mxu0 }
 0x14c   : > { %1500 = vst [vmem:[%s2319_s9 + $0x80] sm:$0xff] %v1464_v26  ;;  %v1467_v31 = vsel %vm1388_vm2, %v1352_v19, %v1431_v22  ;;  %v1312_v32 = vmul.f32 %v1950_v24, %v2297_v14  ;;  %v1952_v33 = vadd.f32 %v1901_v1, %v1849_v29  ;;  %v801_v34 = vpop.f32.mrb[23].mxu1  ;;  %v1905_v35 = vpop.f32.mrb[26].mxu0 }
 0x14d   : > { %1503 = vst [vmem:[%s2319_s9 + $0x98] sm:$0xff] %v1467_v31  ;;  %v1465_v36 = vsel %vm1386_vm3, %v1350_v20, %v1429_v27  ;;  %v1310_v37 = vmul.f32 %v1951_v28, %v2297_v14  ;;  %v1953_v38 = vadd.f32 %v1187_v4, %v801_v34  ;;  %v1203_v9 = vpop.f32.mrb[27].mxu0 }
 0x14e   : > { %1501 = vst [vmem:[%s2319_s9 + $0x88] sm:$0xff] %v1465_v36  ;;  %v1355_v39 = vadd.f32 %v2302_v17, %v1312_v32  ;;  %v1313_v40 = vmul.f32 %v1952_v33, %v2297_v14 }
 0x14f   : > { %v1353_v10 = vadd.f32 %v2302_v17, %v1310_v37  ;;  %v1311_v41 = vmul.f32 %v1953_v38, %v2297_v14 }
 0x150   : > { %vm1391_vm4 = vcmp.gt.f32.partialorder %v1355_v39, 0.0  ;;  %v1434_v42 = vmul.f32 %v2309_v23, %v1355_v39  ;;  %v1356_v11 = vadd.f32 %v2302_v17, %v1313_v40 }
 0x151   : > { %vm1389_vm5 = vcmp.gt.f32.partialorder %v1353_v10, 0.0  ;;  %v1432_v43 = vmul.f32 %v2309_v23, %v1353_v10  ;;  %v1354_v12 = vadd.f32 %v2302_v17, %v1311_v41  ;;  %v1852_v44 = vpop.f32.mrb[24].mxu1 }
 0x152   : > { %v1470_v45 = vsel %vm1391_vm4, %v1355_v39, %v1434_v42  ;;  %vm1392_vm6 = vcmp.gt.f32.partialorder %v1356_v11, 0.0  ;;  %v1435_v46 = vmul.f32 %v2309_v23, %v1356_v11  ;;  %v1954_v47 = vadd.f32 %v1904_v25, %v1852_v44  ;;  %v814_v48 = vpop.f32.mrb[25].mxu1  ;;  %v1908_v49 = vpop.f32.mrb[28].mxu0 }
 0x153   : > { %1506 = vst [vmem:[%s2319_s9 + $0xb0] sm:$0xff] %v1470_v45  ;;  %v1468_v50 = vsel %vm1389_vm5, %v1353_v10, %v1432_v43  ;;  %vm1390_vm7 = vcmp.gt.f32.partialorder %v1354_v12, 0.0  ;;  %v1433_v51 = vmul.f32 %v2309_v23, %v1354_v12  ;;  %v1955_v52 = vadd.f32 %v1200_v30, %v814_v48  ;;  %v1853_v53 = vpop.f32.mrb[26].mxu1  ;;  %v1216_v54 = vpop.f32.mrb[29].mxu0 }
 0x154   : > { %1504 = vst [vmem:[%s2319_s9 + $0xa0] sm:$0xff] %v1468_v50  ;;  %v1471_v55 = vsel %vm1392_vm6, %v1356_v11, %v1435_v46  ;;  %v1316_v56 = vmul.f32 %v1954_v47, %v2297_v14  ;;  %v1956_v57 = vadd.f32 %v1905_v35, %v1853_v53  ;;  %v817_v58 = vpop.f32.mrb[27].mxu1  ;;  %v1909_v59 = vpop.f32.mrb[30].mxu0 }
 0x155   : > { %1507 = vst [vmem:[%s2319_s9 + $0xb8] sm:$0xff] %v1471_v55  ;;  %v1469_v60 = vsel %vm1390_vm7, %v1354_v12, %v1433_v51  ;;  %v1314_v61 = vmul.f32 %v1955_v52, %v2297_v14  ;;  %v1957_v62 = vadd.f32 %v1203_v9, %v817_v58  ;;  %v1219_v63 = vpop.f32.mrb[31].mxu0 }
 0x156   : > { %1505 = vst [vmem:[%s2319_s9 + $0xa8] sm:$0xff] %v1469_v60  ;;  %v1359_v0 = vadd.f32 %v2302_v17, %v1316_v56  ;;  %v1317_v1 = vmul.f32 %v1956_v57, %v2297_v14 }
 0x157   : > { %v1357_v2 = vadd.f32 %v2302_v17, %v1314_v61  ;;  %v1315_v3 = vmul.f32 %v1957_v62, %v2297_v14 }
 0x158   : > { %vm1395_vm8 = vcmp.gt.f32.partialorder %v1359_v0, 0.0  ;;  %v1438_v4 = vmul.f32 %v2309_v23, %v1359_v0  ;;  %v1360_v13 = vadd.f32 %v2302_v17, %v1317_v1 }
 0x159   : > { %vm1393_vm9 = vcmp.gt.f32.partialorder %v1357_v2, 0.0  ;;  %v1436_v15 = vmul.f32 %v2309_v23, %v1357_v2  ;;  %v1358_v16 = vadd.f32 %v2302_v17, %v1315_v3  ;;  %v1856_v5 = vpop.f32.mrb[28].mxu1 }
 0x15a   : > { %v1474_v18 = vsel %vm1395_vm8, %v1359_v0, %v1438_v4  ;;  %vm1396_vm10 = vcmp.gt.f32.partialorder %v1360_v13, 0.0  ;;  %v1439_v19 = vmul.f32 %v2309_v23, %v1360_v13  ;;  %v1958_v6 = vadd.f32 %v1908_v49, %v1856_v5  ;;  %v830_v20 = vpop.f32.mrb[29].mxu1  ;;  %v1912_v21 = vpop.f32.mrb[32].mxu0 }
 0x15b   : > { %1510 = vst [vmem:[%s2319_s9 + $0xd0] sm:$0xff] %v1474_v18  ;;  %v1472_v7 = vsel %vm1393_vm9, %v1357_v2, %v1436_v15  ;;  %vm1394_vm11 = vcmp.gt.f32.partialorder %v1358_v16, 0.0  ;;  %v1437_v22 = vmul.f32 %v2309_v23, %v1358_v16  ;;  %v1959_v24 = vadd.f32 %v1216_v54, %v830_v20  ;;  %v1857_v8 = vpop.f32.mrb[30].mxu1  ;;  %v1232_v25 = vpop.f32.mrb[33].mxu0 }
 0x15c   : > { %1508 = vst [vmem:[%s2319_s9 + $0xc0] sm:$0xff] %v1472_v7  ;;  %v1475_v26 = vsel %vm1396_vm10, %v1360_v13, %v1439_v19  ;;  %v1320_v27 = vmul.f32 %v1958_v6, %v2297_v14  ;;  %v1960_v28 = vadd.f32 %v1909_v59, %v1857_v8  ;;  %v833_v29 = vpop.f32.mrb[31].mxu1  ;;  %v1913_v30 = vpop.f32.mrb[34].mxu0 }
 0x15d   : > { %1511 = vst [vmem:[%s2319_s9 + $0xd8] sm:$0xff] %v1475_v26  ;;  %v1473_v31 = vsel %vm1394_vm11, %v1358_v16, %v1437_v22  ;;  %v1318_v32 = vmul.f32 %v1959_v24, %v2297_v14  ;;  %v1961_v33 = vadd.f32 %v1219_v63, %v833_v29  ;;  %v1235_v34 = vpop.f32.mrb[35].mxu0 }
 0x15e   : > { %1509 = vst [vmem:[%s2319_s9 + $0xc8] sm:$0xff] %v1473_v31  ;;  %v1363_v35 = vadd.f32 %v2302_v17, %v1320_v27  ;;  %v1321_v36 = vmul.f32 %v1960_v28, %v2297_v14 }
 0x15f   : > { %v1361_v37 = vadd.f32 %v2302_v17, %v1318_v32  ;;  %v1319_v38 = vmul.f32 %v1961_v33, %v2297_v14 }
 0x160   : > { %vm1399_vm12 = vcmp.gt.f32.partialorder %v1363_v35, 0.0  ;;  %v1442_v9 = vmul.f32 %v2309_v23, %v1363_v35  ;;  %v1364_v39 = vadd.f32 %v2302_v17, %v1321_v36 }
 0x161   : > { %vm1397_vm13 = vcmp.gt.f32.partialorder %v1361_v37, 0.0  ;;  %v1440_v40 = vmul.f32 %v2309_v23, %v1361_v37  ;;  %v1362_v10 = vadd.f32 %v2302_v17, %v1319_v38  ;;  %v1860_v41 = vpop.f32.mrb[32].mxu1 }
 0x162   : > { %v1478_v42 = vsel %vm1399_vm12, %v1363_v35, %v1442_v9  ;;  %vm1400_vm14 = vcmp.gt.f32.partialorder %v1364_v39, 0.0  ;;  %v1443_v11 = vmul.f32 %v2309_v23, %v1364_v39  ;;  %v1962_v43 = vadd.f32 %v1912_v21, %v1860_v41  ;;  %v846_v12 = vpop.f32.mrb[33].mxu1 }
 0x163   : > { %1514 = vst [vmem:[%s2319_s9 + $0xf0] sm:$0xff] %v1478_v42  ;;  %v1476_v44 = vsel %vm1397_vm13, %v1361_v37, %v1440_v40  ;;  %vm1398_vm15 = vcmp.gt.f32.partialorder %v1362_v10, 0.0  ;;  %v1441_v45 = vmul.f32 %v2309_v23, %v1362_v10  ;;  %v1963_v46 = vadd.f32 %v1232_v25, %v846_v12  ;;  %v1861_v47 = vpop.f32.mrb[34].mxu1 }
 0x164   : > { %1512 = vst [vmem:[%s2319_s9 + $0xe0] sm:$0xff] %v1476_v44  ;;  %v1479_v48 = vsel %vm1400_vm14, %v1364_v39, %v1443_v11  ;;  %v1324_v49 = vmul.f32 %v1962_v43, %v2297_v14  ;;  %v1964_v50 = vadd.f32 %v1913_v30, %v1861_v47  ;;  %v849_v51 = vpop.f32.mrb[35].mxu1 }
 0x165   : > { %1515 = vst [vmem:[%s2319_s9 + $0xf8] sm:$0xff] %v1479_v48  ;;  %v1477_v52 = vsel %vm1398_vm15, %v1362_v10, %v1441_v45  ;;  %v1322_v53 = vmul.f32 %v1963_v46, %v2297_v14  ;;  %v1965_v54 = vadd.f32 %v1235_v34, %v849_v51 }
 0x166   : > { %1513 = vst [vmem:[%s2319_s9 + $0xe8] sm:$0xff] %v1477_v52  ;;  %v1367_v55 = vadd.f32 %v2302_v17, %v1324_v49  ;;  %v1325_v56 = vmul.f32 %v1964_v50, %v2297_v14 }
 0x167   : > { %v1365_v57 = vadd.f32 %v2302_v17, %v1322_v53  ;;  %v1323_v58 = vmul.f32 %v1965_v54, %v2297_v14 }
 0x168   : > { %vm1403_vm0 = vcmp.gt.f32.partialorder %v1367_v55, 0.0  ;;  %v1446_v59 = vmul.f32 %v2309_v23, %v1367_v55  ;;  %v1368_v60 = vadd.f32 %v2302_v17, %v1325_v56 }
 0x169   : > { %vm1401_vm1 = vcmp.gt.f32.partialorder %v1365_v57, 0.0  ;;  %v1444_v61 = vmul.f32 %v2309_v23, %v1365_v57  ;;  %v1366_v62 = vadd.f32 %v2302_v17, %v1323_v58 }
 0x16a   : > { %v1482_v63 = vsel %vm1403_vm0, %v1367_v55, %v1446_v59  ;;  %vm1404_vm2 = vcmp.gt.f32.partialorder %v1368_v60, 0.0  ;;  %v1447_v0 = vmul.f32 %v2309_v23, %v1368_v60 }
 0x16b   : > { %1518 = vst [vmem:[%s2319_s9 + $0x110] sm:$0xff] %v1482_v63  ;;  %v1480_v1 = vsel %vm1401_vm1, %v1365_v57, %v1444_v61  ;;  %vm1402_vm3 = vcmp.gt.f32.partialorder %v1366_v62, 0.0  ;;  %v1445_v14 = vmul.f32 %v2309_v23, %v1366_v62 }
 0x16c   : > { %1516 = vst [vmem:[%s2319_s9 + $0x100] sm:$0xff] %v1480_v1  ;;  %v1483_v2 = vsel %vm1404_vm2, %v1368_v60, %v1447_v0 }
 0x16d   : > { %1519 = vst [vmem:[%s2319_s9 + $0x118] sm:$0xff] %v1483_v2  ;;  %v1481_v3 = vsel %vm1402_vm3, %v1366_v62, %v1445_v14 }
 0x16e   : > { %1517 = vst [vmem:[%s2319_s9 + $0x108] sm:$0xff] %v1481_v3 }
 0x16f PF: > { %s15_s18 = sadd.s32 1, %s2079_s18  }
 0x170   : > { %p12_p4 = scmp.ge.s32.totalorder %s15_s18, 4  }
 0x172   :  { %14 = sbr.rel (!%p12_p4) target bundleno = 1 (0x1), region = 72 }

</bundles_post_ra>
